<compile_context>
chip_gen: v6e
topology: v6e:2x2x1
jax: 0.10.0
libtpu: 0.0.40
codegen_flags: <defaults>
</compile_context>

<pallas_src>
import functools

import jax
import jax.numpy as jnp
from jax import lax
from jax.experimental import pallas as pl
from jax.experimental.pallas import tpu as pltpu


def _basic_block_kernel(x_ref, w1_ref, b1_ref, w2_ref, b2_ref, bsc_ref,
                        masks_ref, out_ref, *, H, W, Cmid, Cout):
    """One image per grid step.

    x_ref    : (1, Cin, H*W)            image, channels in sublanes, spatial in lanes
    w1_ref   : (9*Cmid + Cout, Cin)     conv1 taps stacked + fused 1x1 shortcut rows
                                        (BN scale folded in)
    w2_ref   : (9*Cout, Cmid)           conv2 taps stacked (BN scale folded in)
    b1/b2/bsc: (C, 1)                   folded BN bias per channel
    masks_ref: (9, H*W)                 per-tap border-validity masks (0/1)
    out_ref  : (1, Cout, H*W)
    """
    HW = H * W
    # tap t = kh*3 + kw  ->  flat spatial offset of the input it reads
    offsets = [(kh - 1) * W + (kw - 1) for kh in range(3) for kw in range(3)]

    x = x_ref[0]                       # (Cin, HW)
    masks = masks_ref[...]             # (9, HW)

    # ---- conv1 (all 9 taps) + shortcut 1x1, as ONE matmul -----------------
    z1 = jnp.dot(w1_ref[...], x, preferred_element_type=jnp.float32)  # (9*Cmid+Cout, HW)

    acc1 = jnp.broadcast_to(b1_ref[...], (Cmid, HW))      # bias-initialized accumulator
    for t, off in enumerate(offsets):
        zt = z1[t * Cmid:(t + 1) * Cmid, :]                # 8-aligned sublane slice
        if off == 0:
            acc1 = acc1 + zt                               # center tap: always valid
        else:
            zt = pltpu.roll(zt, shift=(-off) % HW, axis=1)  # XLU lane rotate
            acc1 = acc1 + zt * masks[t:t + 1, :]
    mid = jnp.maximum(acc1, 0.0)                           # relu(bn1(conv1(x)))

    # shortcut = bn_sc(1x1 conv(x)); its matmul rows were fused into w1_ref
    sc = z1[9 * Cmid:9 * Cmid + Cout, :] + bsc_ref[...]

    # ---- conv2 (all 9 taps) as ONE matmul ---------------------------------
    z2 = jnp.dot(w2_ref[...], mid, preferred_element_type=jnp.float32)  # (9*Cout, HW)

    acc2 = jnp.broadcast_to(b2_ref[...], (Cout, HW)) + sc
    for t, off in enumerate(offsets):
        zt = z2[t * Cout:(t + 1) * Cout, :]
        if off == 0:
            acc2 = acc2 + zt
        else:
            zt = pltpu.roll(zt, shift=(-off) % HW, axis=1)
            acc2 = acc2 + zt * masks[t:t + 1, :]

    # ---- residual add (already in acc2 init) + relu -----------------------
    out_ref[0] = jnp.maximum(acc2, 0.0).astype(out_ref.dtype)


def basic_block_pallas(x_nchw, params):
    """x_nchw: (N, Cin, H, W) float32. Returns (N, Cout, H, W) float32."""
    N, Cin, H, W = x_nchw.shape
    HW = H * W
    w1, s1, b1, w2, s2, b2, wsc, ssc, bsc = params
    Cmid = w1.shape[-1]
    Cout = w2.shape[-1]

    # Fold BN scale into the conv weights (per output channel).
    w1f = w1 * s1                    # (3,3,Cin,Cmid)
    w2f = w2 * s2                    # (3,3,Cmid,Cout)
    wscf = wsc * ssc                 # (Cin,Cout)

    # Stack the 9 taps along the output-channel axis: row t*C + o = W_t[o, :].
    w1_mat = jnp.transpose(w1f, (0, 1, 3, 2)).reshape(9 * Cmid, Cin)
    w1_full = jnp.concatenate([w1_mat, wscf.T], axis=0)     # fuse 1x1 shortcut rows
    w2_mat = jnp.transpose(w2f, (0, 1, 3, 2)).reshape(9 * Cout, Cmid)

    b1_c = b1.reshape(Cmid, 1)
    b2_c = b2.reshape(Cout, 1)
    bsc_c = bsc.reshape(Cout, 1)

    # Per-tap validity masks over flattened spatial positions (SAME padding).
    hh = jnp.arange(H)[:, None]
    ww = jnp.arange(W)[None, :]
    mask_list = []
    for kh in range(3):
        for kw in range(3):
            valid = ((hh + kh - 1 >= 0) & (hh + kh - 1 < H) &
                     (ww + kw - 1 >= 0) & (ww + kw - 1 < W))
            mask_list.append(valid.reshape(HW))
    masks = jnp.stack(mask_list).astype(jnp.float32)         # (9, HW)

    x_flat = x_nchw.reshape(N, Cin, HW)

    full = lambda shape: pl.BlockSpec(shape, lambda n, _s=shape: (0,) * len(_s))
    kernel = functools.partial(_basic_block_kernel, H=H, W=W, Cmid=Cmid, Cout=Cout)

    out_flat = pl.pallas_call(
        kernel,
        out_shape=jax.ShapeDtypeStruct((N, Cout, HW), jnp.float32),
        grid_spec=pltpu.PrefetchScalarGridSpec(
            num_scalar_prefetch=0,
            grid=(N,),
            in_specs=[
                pl.BlockSpec((1, Cin, HW), lambda n: (n, 0, 0)),
                full((9 * Cmid + Cout, Cin)),
                full((Cmid, 1)),
                full((9 * Cout, Cmid)),
                full((Cout, 1)),
                full((Cout, 1)),
                full((9, HW)),
            ],
            out_specs=pl.BlockSpec((1, Cout, HW), lambda n: (n, 0, 0)),
        ),
        compiler_params=pltpu.CompilerParams(
            dimension_semantics=("parallel",)),   # v7x: shard batch across 2 TCs
    )(x_flat, w1_full, b1_c, w2_mat, b2_c, bsc_c, masks)

    return out_flat.reshape(N, Cout, H, W)


def _fold_bn(conv_bias, gamma, beta, running_mean, running_var, eps=1e-5):
    scale = gamma / jnp.sqrt(running_var + eps)
    bias = scale * (conv_bias - running_mean) + beta
    return scale, bias


def make_params(key, Cin, Cout):
    """Deterministic synthetic parameters matching BasicBlock.__init__ shapes
    (stride=1, in_channels != out_channels -> 1x1-conv shortcut)."""
    ks = jax.random.split(key, 8)
    # conv weights in HWIO (PyTorch OIHW transposed); conv biases included.
    w1 = 0.1 * jax.random.normal(ks[0], (3, 3, Cin, Cout), jnp.float32)
    cb1 = 0.1 * jax.random.normal(ks[1], (Cout,), jnp.float32)
    w2 = 0.1 * jax.random.normal(ks[2], (3, 3, Cout, Cout), jnp.float32)
    cb2 = 0.1 * jax.random.normal(ks[3], (Cout,), jnp.float32)
    wsc = 0.1 * jax.random.normal(ks[4], (Cin, Cout), jnp.float32)
    cbsc = 0.1 * jax.random.normal(ks[5], (Cout,), jnp.float32)

    # BN params / running stats (inference mode)
    g1 = 1.0 + 0.1 * jax.random.normal(ks[6], (Cout,), jnp.float32)
    be1 = 0.05 * jnp.ones((Cout,), jnp.float32)
    m1 = 0.02 * jnp.ones((Cout,), jnp.float32)
    v1 = 1.0 + 0.1 * jnp.abs(jax.random.normal(ks[7], (Cout,), jnp.float32))
    g2, be2, m2, v2 = g1 * 0.9, -be1, m1 * 0.5, v1 * 1.1
    gsc, besc, msc, vsc = jnp.ones((Cout,)), jnp.zeros((Cout,)), \
        0.01 * jnp.ones((Cout,)), jnp.ones((Cout,))

    s1, b1 = _fold_bn(cb1, g1, be1, m1, v1)
    s2, b2 = _fold_bn(cb2, g2, be2, m2, v2)
    ssc, bsc = _fold_bn(cbsc, gsc, besc, msc, vsc)
    return (w1, s1, b1, w2, s2, b2, wsc, ssc, bsc)


def reference_jax(x_nchw, params):
    """Plain-JAX reference of the same (inference-mode BN) forward pass."""
    w1, s1, b1, w2, s2, b2, wsc, ssc, bsc = params
    dn = ('NCHW', 'HWIO', 'NCHW')
    y = lax.conv_general_dilated(x_nchw, w1, (1, 1), 'SAME',
                                 dimension_numbers=dn)
    y = jnp.maximum(y * s1[None, :, None, None] + b1[None, :, None, None], 0.0)
    y = lax.conv_general_dilated(y, w2, (1, 1), 'SAME',
                                 dimension_numbers=dn)
    y = y * s2[None, :, None, None] + b2[None, :, None, None]
    sc = lax.conv_general_dilated(x_nchw, wsc[None, None], (1, 1), 'SAME',
                                  dimension_numbers=dn)
    sc = sc * ssc[None, :, None, None] + bsc[None, :, None, None]
    return jnp.maximum(y + sc, 0.0)


if __name__ == "__main__":
    N, Cin, Cout, H, W = 2, 4, 8, 16, 16   # x: (2, 4, 16, 16) NCHW
    key = jax.random.PRNGKey(0)
    kx, kp = jax.random.split(key)

    x_nchw = jax.random.normal(kx, (N, Cin, H, W), jnp.float32)
    params = make_params(kp, Cin, Cout)

    out = jax.block_until_ready(basic_block_pallas(x_nchw, params))
    ref = jax.block_until_ready(reference_jax(x_nchw, params))

    assert out.shape == (N, Cout, H, W)
    assert jnp.allclose(out, ref, atol=1e-4, rtol=1e-4), "mismatch vs reference"

    print("KERNEL_OK")
</pallas_src>

<mosaic_0001>
module attributes {stable_mosaic.version = 11 : i64} {
  func.func @_basic_block_kernel(%arg0: i32, %arg1: memref<1x4x256xf32, #tpu.memory_space<vmem>>, %arg2: memref<80x4xf32, #tpu.memory_space<vmem>>, %arg3: memref<8x1xf32, #tpu.memory_space<vmem>>, %arg4: memref<72x8xf32, #tpu.memory_space<vmem>>, %arg5: memref<8x1xf32, #tpu.memory_space<vmem>>, %arg6: memref<8x1xf32, #tpu.memory_space<vmem>>, %arg7: memref<9x256xf32, #tpu.memory_space<vmem>>, %arg8: memref<1x8x256xf32, #tpu.memory_space<vmem>>) attributes {dimension_semantics = [#tpu.dimension_semantics<parallel>], iteration_bounds = array<i64: 2>, scalar_prefetch = 0 : i64, scratch_operands = 0 : i64, tpu.core_type = #tpu.core_type<tc>, window_params = [{transform_indices = @transform_0, window_bounds = array<i64: 1, 4, 256>}, {pipeline_mode = #tpu.pipeline_mode<synchronous>, transform_indices = @transform_1, window_bounds = array<i64: 80, 4>}, {pipeline_mode = #tpu.pipeline_mode<synchronous>, transform_indices = @transform_2, window_bounds = array<i64: 8, 1>}, {pipeline_mode = #tpu.pipeline_mode<synchronous>, transform_indices = @transform_3, window_bounds = array<i64: 72, 8>}, {pipeline_mode = #tpu.pipeline_mode<synchronous>, transform_indices = @transform_4, window_bounds = array<i64: 8, 1>}, {pipeline_mode = #tpu.pipeline_mode<synchronous>, transform_indices = @transform_5, window_bounds = array<i64: 8, 1>}, {pipeline_mode = #tpu.pipeline_mode<synchronous>, transform_indices = @transform_6, window_bounds = array<i64: 9, 256>}, {transform_indices = @transform_7, window_bounds = array<i64: 1, 8, 256>}]} {
    %c0 = arith.constant 0 : index
    %c0_0 = arith.constant 0 : index
    %c0_1 = arith.constant 0 : index
    %0 = vector.load %arg1[%c0, %c0_0, %c0_1] : memref<1x4x256xf32, #tpu.memory_space<vmem>>, vector<1x4x256xf32>
    %1 = vector.shape_cast %0 : vector<1x4x256xf32> to vector<4x256xf32>
    %c0_2 = arith.constant 0 : index
    %c0_3 = arith.constant 0 : index
    %2 = vector.load %arg7[%c0_2, %c0_3] : memref<9x256xf32, #tpu.memory_space<vmem>>, vector<9x256xf32>
    %c0_4 = arith.constant 0 : index
    %c0_5 = arith.constant 0 : index
    %3 = vector.load %arg2[%c0_4, %c0_5] : memref<80x4xf32, #tpu.memory_space<vmem>>, vector<80x4xf32>
    %cst = arith.constant dense<0.000000e+00> : vector<80x256xf32>
    %4 = tpu.matmul %3, %1, %cst {dimension_numbers = #tpu.dot_dimension_numbers<[1], [0], [0], [1], [0, 0, 1, 1], [], []>} : vector<80x4xf32>, vector<4x256xf32>, vector<80x256xf32> -> vector<80x256xf32>
    %c0_6 = arith.constant 0 : index
    %c0_7 = arith.constant 0 : index
    %5 = vector.load %arg3[%c0_6, %c0_7] : memref<8x1xf32, #tpu.memory_space<vmem>>, vector<8x1xf32>
    %6 = vector.shape_cast %5 : vector<8x1xf32> to vector<8x1xf32>
    %7 = vector.broadcast %6 : vector<8x1xf32> to vector<8x256xf32>
    %8 = vector.extract_strided_slice %4 {offsets = [0, 0], sizes = [8, 256], strides = [1, 1]} : vector<80x256xf32> to vector<8x256xf32>
    %c17_i32 = arith.constant 17 : i32
    %9 = tpu.dynamic_rotate %8 by %c17_i32 dim 1 : vector<8x256xf32>, i32 -> vector<8x256xf32>
    %10 = vector.extract_strided_slice %2 {offsets = [0, 0], sizes = [1, 256], strides = [1, 1]} : vector<9x256xf32> to vector<1x256xf32>
    %11 = vector.broadcast %10 : vector<1x256xf32> to vector<8x256xf32>
    %12 = arith.mulf %9, %11 : vector<8x256xf32>
    %13 = arith.addf %7, %12 : vector<8x256xf32>
    %14 = vector.extract_strided_slice %4 {offsets = [8, 0], sizes = [8, 256], strides = [1, 1]} : vector<80x256xf32> to vector<8x256xf32>
    %c16_i32 = arith.constant 16 : i32
    %15 = tpu.dynamic_rotate %14 by %c16_i32 dim 1 : vector<8x256xf32>, i32 -> vector<8x256xf32>
    %16 = vector.extract_strided_slice %2 {offsets = [1, 0], sizes = [1, 256], strides = [1, 1]} : vector<9x256xf32> to vector<1x256xf32>
    %17 = vector.broadcast %16 : vector<1x256xf32> to vector<8x256xf32>
    %18 = arith.mulf %15, %17 : vector<8x256xf32>
    %19 = arith.addf %13, %18 : vector<8x256xf32>
    %20 = vector.extract_strided_slice %4 {offsets = [16, 0], sizes = [8, 256], strides = [1, 1]} : vector<80x256xf32> to vector<8x256xf32>
    %c15_i32 = arith.constant 15 : i32
    %21 = tpu.dynamic_rotate %20 by %c15_i32 dim 1 : vector<8x256xf32>, i32 -> vector<8x256xf32>
    %22 = vector.extract_strided_slice %2 {offsets = [2, 0], sizes = [1, 256], strides = [1, 1]} : vector<9x256xf32> to vector<1x256xf32>
    %23 = vector.broadcast %22 : vector<1x256xf32> to vector<8x256xf32>
    %24 = arith.mulf %21, %23 : vector<8x256xf32>
    %25 = arith.addf %19, %24 : vector<8x256xf32>
    %26 = vector.extract_strided_slice %4 {offsets = [24, 0], sizes = [8, 256], strides = [1, 1]} : vector<80x256xf32> to vector<8x256xf32>
    %c1_i32 = arith.constant 1 : i32
    %27 = tpu.dynamic_rotate %26 by %c1_i32 dim 1 : vector<8x256xf32>, i32 -> vector<8x256xf32>
    %28 = vector.extract_strided_slice %2 {offsets = [3, 0], sizes = [1, 256], strides = [1, 1]} : vector<9x256xf32> to vector<1x256xf32>
    %29 = vector.broadcast %28 : vector<1x256xf32> to vector<8x256xf32>
    %30 = arith.mulf %27, %29 : vector<8x256xf32>
    %31 = arith.addf %25, %30 : vector<8x256xf32>
    %32 = vector.extract_strided_slice %4 {offsets = [32, 0], sizes = [8, 256], strides = [1, 1]} : vector<80x256xf32> to vector<8x256xf32>
    %33 = arith.addf %31, %32 : vector<8x256xf32>
    %34 = vector.extract_strided_slice %4 {offsets = [40, 0], sizes = [8, 256], strides = [1, 1]} : vector<80x256xf32> to vector<8x256xf32>
    %c255_i32 = arith.constant 255 : i32
    %35 = tpu.dynamic_rotate %34 by %c255_i32 dim 1 : vector<8x256xf32>, i32 -> vector<8x256xf32>
    %36 = vector.extract_strided_slice %2 {offsets = [5, 0], sizes = [1, 256], strides = [1, 1]} : vector<9x256xf32> to vector<1x256xf32>
    %37 = vector.broadcast %36 : vector<1x256xf32> to vector<8x256xf32>
    %38 = arith.mulf %35, %37 : vector<8x256xf32>
    %39 = arith.addf %33, %38 : vector<8x256xf32>
    %40 = vector.extract_strided_slice %4 {offsets = [48, 0], sizes = [8, 256], strides = [1, 1]} : vector<80x256xf32> to vector<8x256xf32>
    %c241_i32 = arith.constant 241 : i32
    %41 = tpu.dynamic_rotate %40 by %c241_i32 dim 1 : vector<8x256xf32>, i32 -> vector<8x256xf32>
    %42 = vector.extract_strided_slice %2 {offsets = [6, 0], sizes = [1, 256], strides = [1, 1]} : vector<9x256xf32> to vector<1x256xf32>
    %43 = vector.broadcast %42 : vector<1x256xf32> to vector<8x256xf32>
    %44 = arith.mulf %41, %43 : vector<8x256xf32>
    %45 = arith.addf %39, %44 : vector<8x256xf32>
    %46 = vector.extract_strided_slice %4 {offsets = [56, 0], sizes = [8, 256], strides = [1, 1]} : vector<80x256xf32> to vector<8x256xf32>
    %c240_i32 = arith.constant 240 : i32
    %47 = tpu.dynamic_rotate %46 by %c240_i32 dim 1 : vector<8x256xf32>, i32 -> vector<8x256xf32>
    %48 = vector.extract_strided_slice %2 {offsets = [7, 0], sizes = [1, 256], strides = [1, 1]} : vector<9x256xf32> to vector<1x256xf32>
    %49 = vector.broadcast %48 : vector<1x256xf32> to vector<8x256xf32>
    %50 = arith.mulf %47, %49 : vector<8x256xf32>
    %51 = arith.addf %45, %50 : vector<8x256xf32>
    %52 = vector.extract_strided_slice %4 {offsets = [64, 0], sizes = [8, 256], strides = [1, 1]} : vector<80x256xf32> to vector<8x256xf32>
    %c239_i32 = arith.constant 239 : i32
    %53 = tpu.dynamic_rotate %52 by %c239_i32 dim 1 : vector<8x256xf32>, i32 -> vector<8x256xf32>
    %54 = vector.extract_strided_slice %2 {offsets = [8, 0], sizes = [1, 256], strides = [1, 1]} : vector<9x256xf32> to vector<1x256xf32>
    %55 = vector.broadcast %54 : vector<1x256xf32> to vector<8x256xf32>
    %56 = arith.mulf %53, %55 : vector<8x256xf32>
    %57 = arith.addf %51, %56 : vector<8x256xf32>
    %cst_8 = arith.constant 0.000000e+00 : f32
    %58 = vector.broadcast %cst_8 : f32 to vector<8x256xf32>
    %59 = arith.maximumf %57, %58 : vector<8x256xf32>
    %60 = vector.extract_strided_slice %4 {offsets = [72, 0], sizes = [8, 256], strides = [1, 1]} : vector<80x256xf32> to vector<8x256xf32>
    %c0_9 = arith.constant 0 : index
    %c0_10 = arith.constant 0 : index
    %61 = vector.load %arg6[%c0_9, %c0_10] : memref<8x1xf32, #tpu.memory_space<vmem>>, vector<8x1xf32>
    %62 = vector.broadcast %61 : vector<8x1xf32> to vector<8x256xf32>
    %63 = arith.addf %60, %62 : vector<8x256xf32>
    %c0_11 = arith.constant 0 : index
    %c0_12 = arith.constant 0 : index
    %64 = vector.load %arg4[%c0_11, %c0_12] : memref<72x8xf32, #tpu.memory_space<vmem>>, vector<72x8xf32>
    %cst_13 = arith.constant dense<0.000000e+00> : vector<72x256xf32>
    %65 = tpu.matmul %64, %59, %cst_13 {dimension_numbers = #tpu.dot_dimension_numbers<[1], [0], [0], [1], [0, 0, 1, 1], [], []>} : vector<72x8xf32>, vector<8x256xf32>, vector<72x256xf32> -> vector<72x256xf32>
    %c0_14 = arith.constant 0 : index
    %c0_15 = arith.constant 0 : index
    %66 = vector.load %arg5[%c0_14, %c0_15] : memref<8x1xf32, #tpu.memory_space<vmem>>, vector<8x1xf32>
    %67 = vector.shape_cast %66 : vector<8x1xf32> to vector<8x1xf32>
    %68 = vector.broadcast %67 : vector<8x1xf32> to vector<8x256xf32>
    %69 = arith.addf %68, %63 : vector<8x256xf32>
    %70 = vector.extract_strided_slice %65 {offsets = [0, 0], sizes = [8, 256], strides = [1, 1]} : vector<72x256xf32> to vector<8x256xf32>
    %c17_i32_16 = arith.constant 17 : i32
    %71 = tpu.dynamic_rotate %70 by %c17_i32_16 dim 1 : vector<8x256xf32>, i32 -> vector<8x256xf32>
    %72 = vector.extract_strided_slice %2 {offsets = [0, 0], sizes = [1, 256], strides = [1, 1]} : vector<9x256xf32> to vector<1x256xf32>
    %73 = vector.broadcast %72 : vector<1x256xf32> to vector<8x256xf32>
    %74 = arith.mulf %71, %73 : vector<8x256xf32>
    %75 = arith.addf %69, %74 : vector<8x256xf32>
    %76 = vector.extract_strided_slice %65 {offsets = [8, 0], sizes = [8, 256], strides = [1, 1]} : vector<72x256xf32> to vector<8x256xf32>
    %c16_i32_17 = arith.constant 16 : i32
    %77 = tpu.dynamic_rotate %76 by %c16_i32_17 dim 1 : vector<8x256xf32>, i32 -> vector<8x256xf32>
    %78 = vector.extract_strided_slice %2 {offsets = [1, 0], sizes = [1, 256], strides = [1, 1]} : vector<9x256xf32> to vector<1x256xf32>
    %79 = vector.broadcast %78 : vector<1x256xf32> to vector<8x256xf32>
    %80 = arith.mulf %77, %79 : vector<8x256xf32>
    %81 = arith.addf %75, %80 : vector<8x256xf32>
    %82 = vector.extract_strided_slice %65 {offsets = [16, 0], sizes = [8, 256], strides = [1, 1]} : vector<72x256xf32> to vector<8x256xf32>
    %c15_i32_18 = arith.constant 15 : i32
    %83 = tpu.dynamic_rotate %82 by %c15_i32_18 dim 1 : vector<8x256xf32>, i32 -> vector<8x256xf32>
    %84 = vector.extract_strided_slice %2 {offsets = [2, 0], sizes = [1, 256], strides = [1, 1]} : vector<9x256xf32> to vector<1x256xf32>
    %85 = vector.broadcast %84 : vector<1x256xf32> to vector<8x256xf32>
    %86 = arith.mulf %83, %85 : vector<8x256xf32>
    %87 = arith.addf %81, %86 : vector<8x256xf32>
    %88 = vector.extract_strided_slice %65 {offsets = [24, 0], sizes = [8, 256], strides = [1, 1]} : vector<72x256xf32> to vector<8x256xf32>
    %c1_i32_19 = arith.constant 1 : i32
    %89 = tpu.dynamic_rotate %88 by %c1_i32_19 dim 1 : vector<8x256xf32>, i32 -> vector<8x256xf32>
    %90 = vector.extract_strided_slice %2 {offsets = [3, 0], sizes = [1, 256], strides = [1, 1]} : vector<9x256xf32> to vector<1x256xf32>
    %91 = vector.broadcast %90 : vector<1x256xf32> to vector<8x256xf32>
    %92 = arith.mulf %89, %91 : vector<8x256xf32>
    %93 = arith.addf %87, %92 : vector<8x256xf32>
    %94 = vector.extract_strided_slice %65 {offsets = [32, 0], sizes = [8, 256], strides = [1, 1]} : vector<72x256xf32> to vector<8x256xf32>
    %95 = arith.addf %93, %94 : vector<8x256xf32>
    %96 = vector.extract_strided_slice %65 {offsets = [40, 0], sizes = [8, 256], strides = [1, 1]} : vector<72x256xf32> to vector<8x256xf32>
    %c255_i32_20 = arith.constant 255 : i32
    %97 = tpu.dynamic_rotate %96 by %c255_i32_20 dim 1 : vector<8x256xf32>, i32 -> vector<8x256xf32>
    %98 = vector.extract_strided_slice %2 {offsets = [5, 0], sizes = [1, 256], strides = [1, 1]} : vector<9x256xf32> to vector<1x256xf32>
    %99 = vector.broadcast %98 : vector<1x256xf32> to vector<8x256xf32>
    %100 = arith.mulf %97, %99 : vector<8x256xf32>
    %101 = arith.addf %95, %100 : vector<8x256xf32>
    %102 = vector.extract_strided_slice %65 {offsets = [48, 0], sizes = [8, 256], strides = [1, 1]} : vector<72x256xf32> to vector<8x256xf32>
    %c241_i32_21 = arith.constant 241 : i32
    %103 = tpu.dynamic_rotate %102 by %c241_i32_21 dim 1 : vector<8x256xf32>, i32 -> vector<8x256xf32>
    %104 = vector.extract_strided_slice %2 {offsets = [6, 0], sizes = [1, 256], strides = [1, 1]} : vector<9x256xf32> to vector<1x256xf32>
    %105 = vector.broadcast %104 : vector<1x256xf32> to vector<8x256xf32>
    %106 = arith.mulf %103, %105 : vector<8x256xf32>
    %107 = arith.addf %101, %106 : vector<8x256xf32>
    %108 = vector.extract_strided_slice %65 {offsets = [56, 0], sizes = [8, 256], strides = [1, 1]} : vector<72x256xf32> to vector<8x256xf32>
    %c240_i32_22 = arith.constant 240 : i32
    %109 = tpu.dynamic_rotate %108 by %c240_i32_22 dim 1 : vector<8x256xf32>, i32 -> vector<8x256xf32>
    %110 = vector.extract_strided_slice %2 {offsets = [7, 0], sizes = [1, 256], strides = [1, 1]} : vector<9x256xf32> to vector<1x256xf32>
    %111 = vector.broadcast %110 : vector<1x256xf32> to vector<8x256xf32>
    %112 = arith.mulf %109, %111 : vector<8x256xf32>
    %113 = arith.addf %107, %112 : vector<8x256xf32>
    %114 = vector.extract_strided_slice %65 {offsets = [64, 0], sizes = [8, 256], strides = [1, 1]} : vector<72x256xf32> to vector<8x256xf32>
    %c239_i32_23 = arith.constant 239 : i32
    %115 = tpu.dynamic_rotate %114 by %c239_i32_23 dim 1 : vector<8x256xf32>, i32 -> vector<8x256xf32>
    %116 = vector.extract_strided_slice %2 {offsets = [8, 0], sizes = [1, 256], strides = [1, 1]} : vector<9x256xf32> to vector<1x256xf32>
    %117 = vector.broadcast %116 : vector<1x256xf32> to vector<8x256xf32>
    %118 = arith.mulf %115, %117 : vector<8x256xf32>
    %119 = arith.addf %113, %118 : vector<8x256xf32>
    %cst_24 = arith.constant 0.000000e+00 : f32
    %120 = vector.broadcast %cst_24 : f32 to vector<8x256xf32>
    %121 = arith.maximumf %119, %120 : vector<8x256xf32>
    %c0_25 = arith.constant 0 : index
    %c0_26 = arith.constant 0 : index
    %c0_27 = arith.constant 0 : index
    %122 = vector.load %arg8[%c0_25, %c0_26, %c0_27] : memref<1x8x256xf32, #tpu.memory_space<vmem>>, vector<1x8x256xf32>
    %123 = vector.shape_cast %122 : vector<1x8x256xf32> to vector<8x256xf32>
    %124 = vector.shape_cast %121 : vector<8x256xf32> to vector<1x8x256xf32>
    tpu.vector_store %arg8[%c0_25, %c0_26, %c0_27], %124 {strides = array<i32>} : memref<1x8x256xf32, #tpu.memory_space<vmem>>, vector<1x8x256xf32>,
    return
  }
  func.func @transform_0(%arg0: i32) -> (i32, i32, i32) {
    %c0_i32 = arith.constant 0 : i32
    %c0_i32_0 = arith.constant 0 : i32
    %c0_i32_1 = arith.constant 0 : i32
    return %arg0, %c0_i32, %c0_i32_0 : i32, i32, i32
  }
  func.func @transform_1(%arg0: i32) -> (i32, i32) {
    %c0_i32 = arith.constant 0 : i32
    %c0_i32_0 = arith.constant 0 : i32
    %c0_i32_1 = arith.constant 0 : i32
    return %c0_i32, %c0_i32_0 : i32, i32
  }
  func.func @transform_2(%arg0: i32) -> (i32, i32) {
    %c0_i32 = arith.constant 0 : i32
    %c0_i32_0 = arith.constant 0 : i32
    %c0_i32_1 = arith.constant 0 : i32
    return %c0_i32, %c0_i32_0 : i32, i32
  }
  func.func @transform_3(%arg0: i32) -> (i32, i32) {
    %c0_i32 = arith.constant 0 : i32
    %c0_i32_0 = arith.constant 0 : i32
    %c0_i32_1 = arith.constant 0 : i32
    return %c0_i32, %c0_i32_0 : i32, i32
  }
  func.func @transform_4(%arg0: i32) -> (i32, i32) {
    %c0_i32 = arith.constant 0 : i32
    %c0_i32_0 = arith.constant 0 : i32
    %c0_i32_1 = arith.constant 0 : i32
    return %c0_i32, %c0_i32_0 : i32, i32
  }
  func.func @transform_5(%arg0: i32) -> (i32, i32) {
    %c0_i32 = arith.constant 0 : i32
    %c0_i32_0 = arith.constant 0 : i32
    %c0_i32_1 = arith.constant 0 : i32
    return %c0_i32, %c0_i32_0 : i32, i32
  }
  func.func @transform_6(%arg0: i32) -> (i32, i32) {
    %c0_i32 = arith.constant 0 : i32
    %c0_i32_0 = arith.constant 0 : i32
    %c0_i32_1 = arith.constant 0 : i32
    return %c0_i32, %c0_i32_0 : i32, i32
  }
  func.func @transform_7(%arg0: i32) -> (i32, i32, i32) {
    %c0_i32 = arith.constant 0 : i32
    %c0_i32_0 = arith.constant 0 : i32
    %c0_i32_1 = arith.constant 0 : i32
    return %arg0, %c0_i32, %c0_i32_0 : i32, i32, i32
  }
}

</mosaic_0001>

<bundles_post_ra>
// kernel: tpu_custom_call.1
= control target key start
LH: loop header
LB: loop body
LE: loop exit
PB: predicated region body
PF: predicated region fallthrough
CT: control target
= control target key end

     0   :  { %12 = vsyncpa [#allocation3], 0  ;;  %s1575_s0 = inlined_call_operand.vmem [shape: f32[2,4,256], index: 0, kind: input, shape index: {}]   ;;  %s1576_s1 = inlined_call_operand.vmem [shape: f32[80,4], index: 1, kind: input, shape index: {}]   ;;  %s1577_s2 = inlined_call_operand.vmem [shape: f32[8,1], index: 2, kind: input, shape index: {}]   ;;  %s1578_s3 = inlined_call_operand.vmem [shape: f32[72,8], index: 3, kind: input, shape index: {}]   ;;  %s1579_s4 = inlined_call_operand.vmem [shape: f32[8,1], index: 4, kind: input, shape index: {}]   ;;  %s1580_s5 = inlined_call_operand.vmem [shape: f32[8,1], index: 5, kind: input, shape index: {}]   ;;  %s1581_s6 = inlined_call_operand.vmem [shape: f32[9,256], index: 6, kind: input, shape index: {}]   ;;  %s1582_s7 = inlined_call_operand.hbm [shape: f32[2,8,256], index: 7, kind: output, shape index: {}]  }
   0x1   :  { %14 = vsyncpa [#allocation3 + $0x1], 0  ;;  %s1153_s24 = smov 0   ;;  %s1155_s25 = smov 0  }
   0x2   :  { %s1157_s26 = smov 0   ;;  %s1159_s27 = smov 0  }
   0x3 LB: > { %s1174_s28 = sadd.s32 4294967295, %s1100_s27   ;;  %s951_s29 = sadd.s32 4294967294, %s1100_s27   ;;  %s1100_s27 = sphi %s1159_s27, %s1588_s27   ;;  %s1096_s26 = sphi %s1157_s26, %s1587_s26   ;;  %s1092_s25 = sphi %s1155_s25, %s1586_s25   ;;  %s1088_s24 = sphi %s1153_s24, %s1585_s24  }
   0x4   : > { %s1178_s30 = sadd.s32 1, %s1100_s27   ;;  %s179_s8 = sadd.s32 1, %s1096_s26 }
   0x5   : > { %s176_s9 = ssub.s32 %s1100_s27, %s1178_s30  ;;  %p189_p0 = scmp.ne.s32.totalorder %s1096_s26, %s1092_s25 }
   0x6   : > { %p177_p1 = scmp.eq.s32.totalorder %s176_s9, 0  ;;  %p190_p2 = scmp.eq.s32.totalorder %s1174_s28, 1 }
   0x7   : > { %p195_p3 = scmp.ne.s32.totalorder %s1092_s25, %s1088_s24  ;;  %p196_p4 = scmp.eq.s32.totalorder %s951_s29, 1 }
   0x8   : > { %s1189_s10 = scalar_select %p177_p1, %s1096_s26, %s179_s8  }
   0x9   : > { %p1191_p5 = por %p190_p2, %p189_p0  ;;  %p1195_p6 = por %p196_p4, %p195_p3 }
   0xa   : > { %p954_p7 = scmp.ge.s32.totalorder %s1100_s27, 1  ;;  %p240_p8 = scmp.lt.s32.totalorder %s1100_s27, 3 }
   0xc   : > { %p241_p9 = pnand %p954_p7, %p240_p8 }
   0xd   : > { %p272_p10 = scmp.lt.s32.totalorder (!%p241_p9), %s1174_s28, 1  ;;  %s1104_s9 = smov (!%p241_p9), 17  }
   0xe   : > { %244 = sbr.rel (%p241_p9) target bundleno = 741 (0x2e5), region = 48  ;;  %s1106_s14 = smov (!%p241_p9), 15  }
   0xf   : > { %s1107_s15 = smov (!%p241_p9), 1   ;;  %s1109_s17 = smov (!%p241_p9), 113  }
  0x10   : > { %s1110_s18 = smov (!%p241_p9), 112  }
  0x13   : > { %v1102_v0 = vmov 0.0   ;;  %s273_s13 = scalar_select %p272_p10, %s1174_s28, 1  ;;  %v1103_v1 = vmov 0   ;;  %v455_v2 = vld [vmem:[%s1577_s2] sm:$0xff]  ;;  %vm325_vm0 = vcmask 1043456   ;;  %vm294_vm1 = vcmask 31744  }
  0x14   : > { %394 = vmatprep.mubr.f32.mxu0 %v1102_v0  ;;  %728 = vmatprep.mubr.f32.mxu1 %v1102_v0  ;;  %v282_v5 = vld [vmem:[%s1576_s1] sm:$0xff]  ;;  %v283_v6 = vld [vmem:[%s1576_s1 + $0x8] sm:$0xff]  ;;  %v284_v7 = vld [vmem:[%s1576_s1 + $0x10] sm:$0xff]  ;;  %v465_v36 = vlaneseq  ;;  %vm636_vm10 = vcmask 64512  }
  0x15   : > { %1037 = vset.pattern.permute.xlu0 %v1103_v1  ;;  %1038 = vset.pattern.permute.xlu1 %v1103_v1  ;;  %s986_s16 = sshll.u32 %s273_s13, 3  ;;  %v285_v8 = vld [vmem:[%s1576_s1 + $0x18] sm:$0xff]  ;;  %v286_v9 = vld [vmem:[%s1576_s1 + $0x20] sm:$0xff]  ;;  %v287_v10 = vld [vmem:[%s1576_s1 + $0x28] sm:$0xff]  ;;  %s1105_s13 = smov 16  }
  0x16   : > { %458 = vperm.xlu0 %1037, %v455_v2   ;;  %s276_s19 = scalar_lea.vmem %s1575_s0, %s986_s16  ;;  %v288_v11 = vld [vmem:[%s1576_s1 + $0x30] sm:$0xff]  ;;  %v289_v12 = vld [vmem:[%s1576_s1 + $0x38] sm:$0xff]  ;;  %v290_v13 = vld [vmem:[%s1576_s1 + $0x40] sm:$0xff]  ;;  %s1108_s16 = smov 127   ;;  %v1286_v39 = vshrl.u32 %v465_v36, 7  ;;  %v1288_v40 = vand.u32 127, %v465_v36 }
  0x17   : > { %v277_v3 = vld [vmem:[%s276_s19] sm:$0xff]  ;;  %v291_v14 = vld [vmem:[%s1576_s1 + $0x48] sm:$0xff]  ;;  %s1111_s19 = smov 111  }
  0x18   : > { %v293_v4 = vcombine.high %v277_v3, %v277_v3  ;;  %v619_v33 = vld [vmem:[%s1580_s5] sm:$0xff]  ;;  %v472_v43 = vsub.s32 0, %v1286_v39  ;;  %v1299_v45 = vld [vmem:[%s1581_s6 + $0x8] sm:$0xff]  ;;  %vm467_vm2 = vcmp.lt.s32.totalorder %v1288_v40, 17  ;;  %v491_v46 = vsub.s32 1, %v1286_v39 }
  0x19   : > { %v783_v34 = vld [vmem:[%s1579_s4] sm:$0xff]  ;;  %v510_v49 = vsub.s32 2, %v1286_v39  ;;  %vm486_vm3 = vcmp.lt.s32.totalorder %v1288_v40, 16  ;;  %vm505_vm4 = vcmp.lt.s32.totalorder %v1288_v40, 15  ;;  %v529_v56 = vsub.s32 3, %v1286_v39 }
  0x1a   : > { %958 = vmatprep.subr.msk.mxu0 %vm325_vm0, %v293_v4  ;;  %v1294_v44 = vld [vmem:[%s1581_s6] sm:$0xff]  ;;  %v1308_v51 = vrot.slane %v1299_v45, %v472_v43  ;;  %v1319_v55 = vrot.slane %v1299_v45, %v491_v46  ;;  %vm524_vm5 = vcmp.lt.s32.totalorder %v1288_v40, 1  ;;  %vm545_vm6 = vcmp.lt.s32.totalorder %v1288_v40, 127 }
  0x1b   : > { %959 = vmatpush1.msk.msra.mxu0 %vm325_vm0, %v277_v3  ;;  %v1305_v50 = vrot.slane %v1294_v44, %v472_v43  ;;  %v1316_v54 = vrot.slane %v1294_v44, %v491_v46  ;;  %v1328_v59 = vrot.slane %v1294_v44, %v510_v49  ;;  %v1333_v62 = vrot.slane %v1299_v45, %v510_v49 }
  0x1c   : > { %960 = vmatmul.mubr.msk.f32.vlgmr.msra.gmra.mxu0 %vm294_vm1, %v282_v5  ;;  %vm564_vm7 = vcmp.lt.s32.totalorder %v1288_v40, 113  ;;  %vm583_vm8 = vcmp.lt.s32.totalorder %v1288_v40, 112  ;;  %vm602_vm9 = vcmp.lt.s32.totalorder %v1288_v40, 111 }
  0x1d   : > { %400 = vmatprep.mubr.f32.mxu0 %v1102_v0 }
  0x20   : > { %961 = vmatmul.mubr.msk.f32.gmra.mxu0 %vm294_vm1, %v283_v6  ;;  %v1343_v6 = vrot.slane %v1294_v44, %v529_v56 }
  0x21   : > { %406 = vmatprep.mubr.f32.mxu0 %v1102_v0 }
  0x24   : > { %962 = vmatmul.mubr.msk.f32.gmra.mxu0 %vm294_vm1, %v284_v7  ;;  %v1346_v7 = vrot.slane %v1299_v45, %v529_v56 }
  0x25   : > { %412 = vmatprep.mubr.f32.mxu0 %v1102_v0 }
  0x28   : > { %963 = vmatmul.mubr.msk.f32.gmra.mxu0 %vm294_vm1, %v285_v8 }
  0x29   : > { %418 = vmatprep.mubr.f32.mxu0 %v1102_v0 }
  0x2c   : > { %964 = vmatmul.mubr.msk.f32.gmra.mxu0 %vm294_vm1, %v286_v9 }
  0x2d   : > { %424 = vmatprep.mubr.f32.mxu0 %v1102_v0 }
  0x30   : > { %965 = vmatmul.mubr.msk.f32.gmra.mxu0 %vm294_vm1, %v287_v10  ;;  %v550_v10 = vsub.s32 5, %v1286_v39 }
  0x31   : > { %430 = vmatprep.mubr.f32.mxu0 %v1102_v0 }
  0x34   : > { %966 = vmatmul.mubr.msk.f32.gmra.mxu0 %vm294_vm1, %v288_v11 }
  0x35   : > { %436 = vmatprep.mubr.f32.mxu0 %v1102_v0 }
  0x38   : > { %967 = vmatmul.mubr.msk.f32.gmra.mxu0 %vm294_vm1, %v289_v12 }
  0x39   : > { %442 = vmatprep.mubr.f32.mxu0 %v1102_v0 }
  0x3c   : > { %968 = vmatmul.mubr.msk.f32.gmra.mxu0 %vm294_vm1, %v290_v13 }
  0x3d   : > { %448 = vmatprep.mubr.f32.mxu0 %v1102_v0 }
  0x40   : > { %969 = vmatmul.mubr.msk.f32.gmra.mxu0 %vm294_vm1, %v291_v14 }
  0x91   : > { %v459_v35 = vpop.permute.xlu0 %458 }
  0xdc   : > { %v396_v15 = vpop.f32.mrf.mxu0 }
  0xdd   : > { %461 = vrot.lane.b32.xlu0 %v396_v15, %s1104_s9 }
  0xde   : > { %v398_v16 = vpop.f32.mrf.mxu0 }
  0xdf   : > { %463 = vrot.lane.b32.xlu1 %v398_v16, %s1104_s9  ;;  %v569_v16 = vsub.s32 6, %v1286_v39 }
  0xe0   : > { %v402_v17 = vpop.f32.mrf.mxu0 }
  0xe2   : > { %v404_v18 = vpop.f32.mrf.mxu0 }
  0xe3   : > { %482 = vrot.lane.b32.xlu1 %v402_v17, %s1105_s13  ;;  %484 = vrot.lane.b32.xlu0 %v404_v18, %s1105_s13 }
  0xe4   : > { %v408_v19 = vpop.f32.mrf.mxu0 }
  0xe6   : > { %v410_v20 = vpop.f32.mrf.mxu0 }
  0xe7   : > { %501 = vrot.lane.b32.xlu1 %v408_v19, %s1106_s14  ;;  %503 = vrot.lane.b32.xlu0 %v410_v20, %s1106_s14 }
  0xe8   : > { %v414_v21 = vpop.f32.mrf.mxu0 }
  0xea   : > { %v416_v22 = vpop.f32.mrf.mxu0 }
  0xeb   : > { %520 = vrot.lane.b32.xlu1 %v414_v21, %s1107_s15  ;;  %522 = vrot.lane.b32.xlu0 %v416_v22, %s1107_s15  ;;  %v1360_v22 = vrot.slane %v1294_v44, %v550_v10 }
  0xec   : > { %v1268_v23 = vpop.f32.mrf.mxu0 }
  0xee   : > { %v1270_v24 = vpop.f32.mrf.mxu0 }
  0xf0   : > { %v426_v25 = vpop.f32.mrf.mxu0 }
  0xf1   : > { %541 = vrot.lane.b32.xlu1 %v426_v25, %s1108_s16  ;;  %v1363_v25 = vrot.slane %v1299_v45, %v550_v10 }
  0xf2   : > { %v428_v26 = vpop.f32.mrf.mxu0 }
  0xf3   : > { %543 = vrot.lane.b32.xlu0 %v428_v26, %s1108_s16 }
  0xf4   : > { %v432_v27 = vpop.f32.mrf.mxu0 }
  0xf5   : > { %560 = vrot.lane.b32.xlu1 %v432_v27, %s1109_s17 }
  0xf6   : > { %v434_v28 = vpop.f32.mrf.mxu0 }
  0xf7   : > { %562 = vrot.lane.b32.xlu0 %v434_v28, %s1109_s17 }
  0xf8   : > { %v438_v29 = vpop.f32.mrf.mxu0 }
  0xf9   : > { %579 = vrot.lane.b32.xlu1 %v438_v29, %s1110_s18  ;;  %v588_v29 = vsub.s32 7, %v1286_v39 }
  0xfa   : > { %v440_v30 = vpop.f32.mrf.mxu0 }
  0xfb   : > { %581 = vrot.lane.b32.xlu0 %v440_v30, %s1110_s18  ;;  %v1385_v43 = vrot.slane %v1294_v44, %v588_v29  ;;  %v1388_v46 = vrot.slane %v1299_v45, %v588_v29 }
  0xfc   : > { %v444_v31 = vpop.f32.mrf.mxu0 }
  0xfd   : > { %598 = vrot.lane.b32.xlu1 %v444_v31, %s1111_s19 }
  0xfe   : > { %v446_v32 = vpop.f32.mrf.mxu0 }
  0xff   : > { %600 = vrot.lane.b32.xlu0 %v446_v32, %s1111_s19 }
 0x101   : > { %622 = vperm.xlu1 %1038, %v619_v33  }
 0x103   : > { %786 = vperm.xlu0 %1037, %v783_v34   ;;  %v1372_v34 = vrot.slane %v1294_v44, %v569_v16 }
 0x14f   : > { %v462_v37 = vpop.permute.xlu0 %461 }
 0x151   : > { %v464_v38 = vpop.permute.xlu1 %463 }
 0x152   : > { %v468_v52 = vsel %vm467_vm2, %v462_v37, %v464_v38  ;;  %v469_v53 = vsel %vm467_vm2, %v464_v38, %v462_v37 }
 0x153   : > { %v478_v60 = vmul.f32 %v1305_v50, %v469_v53  ;;  %v479_v61 = vmul.f32 %v1308_v51, %v468_v52 }
 0x155   : > { %v483_v41 = vpop.permute.xlu1 %482  ;;  %v485_v42 = vpop.permute.xlu0 %484  ;;  %v480_v11 = vadd.f32 %v478_v60, %v459_v35  ;;  %v481_v12 = vadd.f32 %v479_v61, %v459_v35  ;;  %v1375_v35 = vrot.slane %v1299_v45, %v569_v16  ;;  %v1409_v60 = vld [vmem:[%s1581_s6 + $0x18] ss:$0 sm:$0xff]  ;;  %v628_v16 = vld [vmem:[%s1578_s3 + $0x8] sm:$0xff] }
 0x156   : > { %v487_v57 = vsel %vm486_vm3, %v483_v41, %v485_v42  ;;  %v488_v58 = vsel %vm486_vm3, %v485_v42, %v483_v41 }
 0x157   : > { %v497_v4 = vmul.f32 %v1316_v54, %v488_v58  ;;  %v498_v5 = vmul.f32 %v1319_v55, %v487_v57 }
 0x159   : > { %v502_v47 = vpop.permute.xlu1 %501  ;;  %v504_v48 = vpop.permute.xlu0 %503  ;;  %v499_v17 = vadd.f32 %v497_v4, %v480_v11  ;;  %v500_v18 = vadd.f32 %v498_v5, %v481_v12 }
 0x15a   : > { %v506_v2 = vsel %vm505_vm4, %v502_v47, %v504_v48  ;;  %v507_v3 = vsel %vm505_vm4, %v504_v48, %v502_v47 }
 0x15b   : > { %v516_v13 = vmul.f32 %v1328_v59, %v507_v3  ;;  %v517_v14 = vmul.f32 %v1333_v62, %v506_v2 }
 0x15d   : > { %v521_v63 = vpop.permute.xlu1 %520  ;;  %v523_v1 = vpop.permute.xlu0 %522  ;;  %v518_v26 = vadd.f32 %v516_v13, %v499_v17  ;;  %v519_v27 = vadd.f32 %v517_v14, %v500_v18  ;;  %v629_v17 = vld [vmem:[%s1578_s3 + $0x10] sm:$0xff]  ;;  %v630_v18 = vld [vmem:[%s1578_s3 + $0x18] sm:$0xff] }
 0x15e   : > { %v525_v8 = vsel %vm524_vm5, %v521_v63, %v523_v1  ;;  %v526_v9 = vsel %vm524_vm5, %v523_v1, %v521_v63 }
 0x15f   : > { %v535_v19 = vmul.f32 %v1343_v6, %v526_v9  ;;  %v536_v20 = vmul.f32 %v1346_v7, %v525_v8 }
 0x161   : > { %v537_v32 = vadd.f32 %v535_v19, %v518_v26  ;;  %v538_v33 = vadd.f32 %v536_v20, %v519_v27  ;;  %v631_v19 = vld [vmem:[%s1578_s3 + $0x20] sm:$0xff]  ;;  %v632_v20 = vld [vmem:[%s1578_s3 + $0x28] sm:$0xff]  ;;  %v634_v26 = vld [vmem:[%s1578_s3 + $0x38] sm:$0xff] }
 0x162   : > { %v635_v27 = vld [vmem:[%s1578_s3 + $0x40] sm:$0xff] }
 0x163   : > { %v542_v15 = vpop.permute.xlu1 %541  ;;  %v539_v47 = vadd.f32 %v537_v32, %v1268_v23  ;;  %v540_v48 = vadd.f32 %v538_v33, %v1270_v24  ;;  %v1404_v24 = vld [vmem:[%s1581_s6 + $0x10] ss:$0 sm:$0xff] }
 0x165   : > { %v544_v21 = vpop.permute.xlu0 %543 }
 0x166   : > { %v546_v30 = vsel %vm545_vm6, %v542_v15, %v544_v21  ;;  %v547_v31 = vsel %vm545_vm6, %v544_v21, %v542_v15  ;;  %v627_v15 = vld [vmem:[%s1578_s3] sm:$0xff]  ;;  %v633_v21 = vld [vmem:[%s1578_s3 + $0x30] sm:$0xff] }
 0x167   : > { %v561_v28 = vpop.permute.xlu1 %560  ;;  %v556_v39 = vmul.f32 %v1360_v22, %v546_v30  ;;  %v557_v41 = vmul.f32 %v1363_v25, %v547_v31 }
 0x169   : > { %v563_v36 = vpop.permute.xlu0 %562  ;;  %v558_v44 = vadd.f32 %v556_v39, %v539_v47  ;;  %v559_v45 = vadd.f32 %v557_v41, %v540_v48 }
 0x16a   : > { %v565_v37 = vsel %vm564_vm7, %v561_v28, %v563_v36  ;;  %v566_v38 = vsel %vm564_vm7, %v563_v36, %v561_v28 }
 0x16b   : > { %v580_v42 = vpop.permute.xlu1 %579  ;;  %v575_v49 = vmul.f32 %v1372_v34, %v565_v37  ;;  %v576_v52 = vmul.f32 %v1375_v35, %v566_v38 }
 0x16d   : > { %v582_v53 = vpop.permute.xlu0 %581  ;;  %v577_v61 = vadd.f32 %v575_v49, %v558_v44  ;;  %v578_v2 = vadd.f32 %v576_v52, %v559_v45 }
 0x16e   : > { %v584_v56 = vsel %vm583_vm8, %v580_v42, %v582_v53  ;;  %v585_v57 = vsel %vm583_vm8, %v582_v53, %v580_v42 }
 0x16f   : > { %v594_v58 = vmul.f32 %v1385_v43, %v584_v56  ;;  %v595_v23 = vmul.f32 %v1388_v46, %v585_v57  ;;  %v599_v63 = vpop.permute.xlu1 %598 }
 0x171   : > { %v601_v1 = vpop.permute.xlu0 %600  ;;  %v597_v8 = vadd.f32 %v595_v23, %v578_v2  ;;  %v596_v10 = vadd.f32 %v594_v58, %v577_v61  ;;  %v450_v61 = vpop.f32.mrf.mxu0 }
 0x172   : > { %v603_v3 = vsel %vm602_vm9, %v599_v63, %v601_v1  ;;  %v604_v4 = vsel %vm602_vm9, %v601_v1, %v599_v63 }
 0x173   : > { %v613_v5 = vmul.f32 %v1404_v24, %v603_v3  ;;  %v614_v9 = vmul.f32 %v1409_v60, %v604_v4  ;;  %v452_v2 = vpop.f32.mrf.mxu0 }
 0x175   : > { %v616_v11 = vadd.f32 %v614_v9, %v597_v8  ;;  %v615_v12 = vadd.f32 %v613_v5, %v596_v10 }
 0x177   : > { %v618_v13 = vmax.f32 %v616_v11, 0.0  ;;  %v617_v14 = vmax.f32 %v615_v12, 0.0 }
 0x179   : > { %694 = vmatprep.subr.mxu1 %v618_v13 }
 0x17a   : > { %695 = vmatpush1.msra.mxu1 %v617_v14 }
 0x17b   : > { %972 = vmatmul.mubr.msk.f32.vlgmr.msra.gmra.mxu1 %vm636_vm10, %v627_v15 }
 0x17c   : > { %734 = vmatprep.mubr.f32.mxu1 %v1102_v0  ;;  %v623_v56 = vpop.permute.xlu1 %622 }
 0x17d   : > { %v625_v5 = vadd.f32 %v623_v56, %v450_v61  ;;  %v626_v8 = vadd.f32 %v623_v56, %v452_v2 }
 0x17e   : > { %v787_v57 = vpop.permute.xlu0 %786 }
 0x17f   : > { %973 = vmatmul.mubr.msk.f32.gmra.mxu1 %vm636_vm10, %v628_v16 }
 0x180   : > { %740 = vmatprep.mubr.f32.mxu1 %v1102_v0 }
 0x183   : > { %974 = vmatmul.mubr.msk.f32.gmra.mxu1 %vm636_vm10, %v629_v17  ;;  %v789_v17 = vadd.f32 %v787_v57, %v625_v5 }
 0x184   : > { %746 = vmatprep.mubr.f32.mxu1 %v1102_v0 }
 0x187   : > { %975 = vmatmul.mubr.msk.f32.gmra.mxu1 %vm636_vm10, %v630_v18  ;;  %v790_v18 = vadd.f32 %v787_v57, %v626_v8 }
 0x188   : > { %752 = vmatprep.mubr.f32.mxu1 %v1102_v0 }
 0x18b   : > { %976 = vmatmul.mubr.msk.f32.gmra.mxu1 %vm636_vm10, %v631_v19 }
 0x18c   : > { %758 = vmatprep.mubr.f32.mxu1 %v1102_v0 }
 0x18f   : > { %977 = vmatmul.mubr.msk.f32.gmra.mxu1 %vm636_vm10, %v632_v20 }
 0x190   : > { %764 = vmatprep.mubr.f32.mxu1 %v1102_v0 }
 0x193   : > { %978 = vmatmul.mubr.msk.f32.gmra.mxu1 %vm636_vm10, %v633_v21 }
 0x194   : > { %770 = vmatprep.mubr.f32.mxu1 %v1102_v0 }
 0x197   : > { %979 = vmatmul.mubr.msk.f32.gmra.mxu1 %vm636_vm10, %v634_v26 }
 0x198   : > { %776 = vmatprep.mubr.f32.mxu1 %v1102_v0 }
 0x19b   : > { %980 = vmatmul.mubr.msk.f32.gmra.mxu1 %vm636_vm10, %v635_v27 }
 0x23b   : > { %v730_v28 = vpop.f32.mrf.mxu1 }
 0x23c   : > { %791 = vrot.lane.b32.xlu1 %v730_v28, %s1104_s9 }
 0x23d   : > { %v732_v29 = vpop.f32.mrf.mxu1 }
 0x23e   : > { %793 = vrot.lane.b32.xlu0 %v732_v29, %s1104_s9  ;;  %s269_s9 = sand.u32 1, %s1092_s25  }
 0x23f   : > { %v736_v30 = vpop.f32.mrf.mxu1  ;;  %s878_s20 = scalar_lea.sflag [#allocation3], %s269_s9 }
 0x240   : > { %801 = vrot.lane.b32.xlu1 %v736_v30, %s1105_s13 }
 0x241   : > { %v738_v31 = vpop.f32.mrf.mxu1 }
 0x242   : > { %803 = vrot.lane.b32.xlu0 %v738_v31, %s1105_s13  ;;  %s955_s13 = sshll.u32 %s269_s9, 4 }
 0x243   : > { %v742_v32 = vpop.f32.mrf.mxu1 }
 0x244   : > { %811 = vrot.lane.b32.xlu1 %v742_v32, %s1106_s14 }
 0x245   : > { %v744_v0 = vpop.f32.mrf.mxu1 }
 0x246   : > { %813 = vrot.lane.b32.xlu0 %v744_v0, %s1106_s14  ;;  %s987_s14 = sshll.u32 %s1174_s28, 8  ;;  %s1112_s28 = smov [#allocation2]  }
 0x247   : > { %v748_v33 = vpop.f32.mrf.mxu1  ;;  %s1044_s22 = sshll.u32 %s1112_s28, 4  ;;  %s1045_s22 = int_to_ptr.vmem [resolvable:$false] %s1044_s22 }
 0x248   : > { %821 = vrot.lane.b32.xlu1 %v748_v33, %s1107_s15  ;;  %s1046_s23 = scalar_lea.vmem %s1045_s22, 512 }
 0x249   : > { %v750_v36 = vpop.f32.mrf.mxu1 }
 0x24a   : > { %823 = vrot.lane.b32.xlu0 %v750_v36, %s1107_s15  ;;  %s271_s15 = scalar_lea.vmem [#allocation2], %s955_s13 }
 0x24b   : > { %v1469_v37 = vpop.f32.mrf.mxu1 }
 0x24d   : > { %v1471_v38 = vpop.f32.mrf.mxu1 }
 0x24f   : > { %v760_v39 = vpop.f32.mrf.mxu1 }
 0x250   : > { %833 = vrot.lane.b32.xlu1 %v760_v39, %s1108_s16 }
 0x251   : > { %v762_v41 = vpop.f32.mrf.mxu1 }
 0x252   : > { %835 = vrot.lane.b32.xlu0 %v762_v41, %s1108_s16  ;;  %s892_s16 = sshll.u32 %s271_s15, 4  ;;  %s893_s16 = int_to_ptr.vmem [resolvable:$true] %s892_s16 }
 0x253   : > { %v766_v42 = vpop.f32.mrf.mxu1  ;;  %s1040_s21 = scalar_lea.vmem %s893_s16, 256  ;;  %p1047_p0 = scmp.lt.s32.totalorder %s893_s16, %s1045_s22 }
 0x254   : > { %843 = vrot.lane.b32.xlu1 %v766_v42, %s1109_s17  ;;  %p1041_p11 = scmp.ne.s32.totalorder %s893_s16, %s1040_s21  ;;  %p1048_p1 = scmp.lt.s32.totalorder %s1046_s23, %s1040_s21 }
 0x255   : > { %v768_v47 = vpop.f32.mrf.mxu1 }
 0x256   : > { %845 = vrot.lane.b32.xlu0 %v768_v47, %s1109_s17  ;;  %p1042_p12 = pnand %p1041_p11, %p1191_p5  ;;  %p1049_p2 = por %p1048_p1, %p1047_p0 }
 0x257   : > { %v772_v48 = vpop.f32.mrf.mxu1 }
 0x258   : > { %853 = vrot.lane.b32.xlu1 %v772_v48, %s1110_s18  ;;  %p1043_p13 = pneg %p1042_p12 }
 0x259   : > { %v774_v49 = vpop.f32.mrf.mxu1 }
 0x25a   : > { %855 = vrot.lane.b32.xlu0 %v774_v49, %s1110_s18  ;;  %p1050_p3 = pnand %p1049_p2, %p1043_p13 }
 0x25b   : > { %v778_v52 = vpop.f32.mrf.mxu1 }
 0x25c   : > { %863 = vrot.lane.b32.xlu1 %v778_v52, %s1111_s19 }
 0x25d   : > { %v780_v53 = vpop.f32.mrf.mxu1 }
 0x25e   : > { %865 = vrot.lane.b32.xlu0 %v780_v53, %s1111_s19  ;;  %s1538_s19 = scalar_lea.hbm %s1582_s7, %s987_s14 }
 0x2ae   : > { %v792_v44 = vpop.permute.xlu1 %791 }
 0x2b0   : > { %v794_v45 = vpop.permute.xlu0 %793 }
 0x2b1   : > { %v795_v3 = vsel %vm467_vm2, %v792_v44, %v794_v45  ;;  %v796_v4 = vsel %vm467_vm2, %v794_v45, %v792_v44 }
 0x2b2   : > { %v802_v58 = vpop.permute.xlu1 %801  ;;  %v797_v11 = vmul.f32 %v796_v4, %v1305_v50  ;;  %v798_v12 = vmul.f32 %v795_v3, %v1308_v51 }
 0x2b4   : > { %v804_v23 = vpop.permute.xlu0 %803  ;;  %v799_v51 = vadd.f32 %v797_v11, %v789_v17  ;;  %v800_v26 = vadd.f32 %v798_v12, %v790_v18 }
 0x2b5   : > { %v805_v9 = vsel %vm486_vm3, %v802_v58, %v804_v23  ;;  %v806_v10 = vsel %vm486_vm3, %v804_v23, %v802_v58 }
 0x2b6   : > { %v812_v63 = vpop.permute.xlu1 %811  ;;  %v807_v19 = vmul.f32 %v806_v10, %v1316_v54  ;;  %v808_v20 = vmul.f32 %v805_v9, %v1319_v55 }
 0x2b8   : > { %v814_v1 = vpop.permute.xlu0 %813  ;;  %v809_v30 = vadd.f32 %v807_v19, %v799_v51  ;;  %v810_v31 = vadd.f32 %v808_v20, %v800_v26 }
 0x2b9   : > { %v815_v15 = vsel %vm505_vm4, %v812_v63, %v814_v1  ;;  %v816_v16 = vsel %vm505_vm4, %v814_v1, %v812_v63 }
 0x2ba   : > { %v822_v13 = vpop.permute.xlu1 %821  ;;  %v817_v27 = vmul.f32 %v816_v16, %v1328_v59  ;;  %v818_v28 = vmul.f32 %v815_v15, %v1333_v62 }
 0x2bc   : > { %v824_v14 = vpop.permute.xlu0 %823  ;;  %v819_v0 = vadd.f32 %v817_v27, %v809_v30  ;;  %v820_v33 = vadd.f32 %v818_v28, %v810_v31 }
 0x2bd   : > { %v825_v21 = vsel %vm524_vm5, %v822_v13, %v824_v14  ;;  %v826_v50 = vsel %vm524_vm5, %v824_v14, %v822_v13 }
 0x2be   : > { %v827_v32 = vmul.f32 %v826_v50, %v1343_v6  ;;  %v828_v54 = vmul.f32 %v825_v21, %v1346_v7 }
 0x2c0   : > { %v829_v41 = vadd.f32 %v827_v32, %v819_v0  ;;  %v830_v62 = vadd.f32 %v828_v54, %v820_v33 }
 0x2c2   : > { %v834_v29 = vpop.permute.xlu1 %833  ;;  %v831_v52 = vadd.f32 %v829_v41, %v1469_v37  ;;  %v832_v53 = vadd.f32 %v830_v62, %v1471_v38 }
 0x2c4   : > { %v836_v55 = vpop.permute.xlu0 %835 }
 0x2c5   : > { %v837_v39 = vsel %vm545_vm6, %v834_v29, %v836_v55  ;;  %v838_v59 = vsel %vm545_vm6, %v836_v55, %v834_v29 }
 0x2c6   : > { %v844_v36 = vpop.permute.xlu1 %843  ;;  %v839_v47 = vmul.f32 %v837_v39, %v1360_v22  ;;  %v840_v48 = vmul.f32 %v838_v59, %v1363_v25 }
 0x2c8   : > { %v846_v42 = vpop.permute.xlu0 %845  ;;  %v841_v22 = vadd.f32 %v839_v47, %v831_v52  ;;  %v842_v25 = vadd.f32 %v840_v48, %v832_v53 }
 0x2c9   : > { %v847_v6 = vsel %vm564_vm7, %v844_v36, %v846_v42  ;;  %v848_v7 = vsel %vm564_vm7, %v846_v42, %v844_v36 }
 0x2ca   : > { %v854_v49 = vpop.permute.xlu1 %853  ;;  %v849_v56 = vmul.f32 %v847_v6, %v1372_v34  ;;  %v850_v57 = vmul.f32 %v848_v7, %v1375_v35 }
 0x2cc   : > { %v856_v44 = vpop.permute.xlu0 %855  ;;  %v851_v23 = vadd.f32 %v849_v56, %v841_v22  ;;  %v852_v34 = vadd.f32 %v850_v57, %v842_v25 }
 0x2cd   : > { %v857_v45 = vsel %vm583_vm8, %v854_v49, %v856_v44  ;;  %v858_v58 = vsel %vm583_vm8, %v856_v44, %v854_v49 }
 0x2ce   : > { %v859_v37 = vmul.f32 %v857_v45, %v1385_v43  ;;  %v860_v38 = vmul.f32 %v858_v58, %v1388_v46  ;;  %v864_v61 = vpop.permute.xlu1 %863 }
 0x2d0   : > { %v866_v35 = vpop.permute.xlu0 %865  ;;  %v861_v2 = vadd.f32 %v859_v37, %v851_v23  ;;  %v862_v3 = vadd.f32 %v860_v38, %v852_v34 }
 0x2d1   : > { %v867_v63 = vsel %vm602_vm9, %v864_v61, %v866_v35  ;;  %v868_v1 = vsel %vm602_vm9, %v866_v35, %v864_v61 }
 0x2d2   : > { %v869_v4 = vmul.f32 %v1404_v24, %v867_v63  ;;  %v870_v43 = vmul.f32 %v1409_v60, %v868_v1 }
 0x2d4   : > { %v871_v46 = vadd.f32 %v869_v4, %v861_v2  ;;  %v872_v5 = vadd.f32 %v870_v43, %v862_v3 }
 0x2d6   : > { %v873_v8 = vmax.f32 %v871_v46, 0.0  ;;  %v874_v9 = vmax.f32 %v872_v5, 0.0 }
 0x2d8   : > { %875 = vst [vmem:[%s271_s15] sm:$0xff] %v873_v8  ;;  %876 = vst [vmem:[%s271_s15 + $0x8] sm:$0xff] %v874_v9 }
 0x2d9   : > { %1053 = shalt.err (!%p1050_p3)
}
 0x2da   : > { %s1054_s29 = scalar_lea.hbm %s1538_s19, 256  ;;  %s1058_s13 = scalar_lea.hbm %s1582_s7, 512 }
 0x2db   : > { %p1055_p4 = scmp.ne.s32.totalorder %s1538_s19, %s1054_s29  ;;  %p1059_p9 = scmp.lt.s32.totalorder %s1538_s19, %s1582_s7 }
 0x2dc   : > { %p1060_p10 = scmp.lt.s32.totalorder %s1058_s13, %s1054_s29 }
 0x2dd   : > { %p1056_p7 = pnand %p1055_p4, %p1191_p5 }
 0x2de   : > { %p1061_p11 = por %p1060_p10, %p1059_p9 }
 0x2df   : > { %p1057_p8 = pneg %p1056_p7 }
 0x2e1   : > { %p1062_p12 = pnand %p1061_p11, %p1057_p8 }
 0x2e3   : > { %1065 = shalt.err (!%p1062_p12)
}
 0x2e4   : > { %988 = dma.vmem_to_hbm [thread:$0]  (%p1191_p5), %s893_s16, 256, %s1538_s19, %s878_s20  }
 0x2e5 PF: > { %p994_p13 = scmp.ge.s32.totalorder %s1100_s27, 2  ;;  %s904_s17 = sand.u32 1, %s1088_s24  }
 0x2e6   : > { %s905_s18 = scalar_lea.sflag [#allocation3], %s904_s17 }
 0x2e7   : > { %p991_p0 = pnand %p994_p13, %p1195_p6 }
 0x2e9   : > { %p992_p1 = pneg %p991_p0 }
 0x2eb   : > { %1083 = dma.done.wait (%p992_p1), %s905_s18, 256  }
 0x2ec   : > { %1085 = vsyncadd (%p992_p1), %s905_s18, 4294967040  ;;  %p17_p2 = scmp.ge.s32.totalorder %s1178_s30, 4   ;;  %s1585_s24 = smov %s1092_s25 }
 0x2ed   : > { %s1586_s25 = smov %s1096_s26  ;;  %s1587_s26 = smov %s1189_s10 }
 0x2ee   : > { %s1588_s27 = smov %s1178_s30  ;;  %19 = sbr.rel (!%p17_p2) target bundleno = 3 (0x3), region = 83 }
 0x2f3   :  { %910 = vsyncpa [#allocation3], 1 }
 0x2f4   :  { %912 = vsyncpa [#allocation3 + $0x1], 1 }

</bundles_post_ra>
